<compile_context>
chip_gen: v7x
topology: tpu7x:2x2x1
jax: 0.10.0
libtpu: 0.0.40
codegen_flags: <defaults>
</compile_context>

<pallas_src>
import functools
import inspect

import jax
import jax.numpy as jnp
from jax.experimental import pallas as pl
from jax.experimental.pallas import tpu as pltpu


_NEG_BIG = -1e30  # finite "-inf" for padded label columns (no inf-inf NaN risk)


def _round_up(x: int, m: int) -> int:
    return ((x + m - 1) // m) * m


def _cdiv(a: int, b: int) -> int:
    return (a + b - 1) // b


@functools.lru_cache(maxsize=None)
def _vmem_budget_bytes() -> int:
    """~75% of physical VMEM: ~96 MiB on v5e/v6e, ~48 MiB on v7x, 48 MiB fallback."""
    cap = 64 * 2**20
    try:
        cap = int(pltpu.get_tpu_info().vmem_capacity_bytes)
    except Exception:
        pass
    return int(min(max(32 * 2**20, (cap * 3) // 4), 100 * 2**20))


def _invariant_buffer_kwargs():
    """pipeline_mode=pl.Buffered(1) for grid-invariant operands, if supported."""
    try:
        if hasattr(pl, "Buffered") and (
            "pipeline_mode" in inspect.signature(pl.BlockSpec).parameters
        ):
            return {"pipeline_mode": pl.Buffered(1)}
    except (TypeError, ValueError):
        pass
    return {}


def _softmax_store(logits, o_ref):
    # Numerically stable softmax over the last axis (== PyTorch Softmax(1)).
    m = jnp.max(logits, axis=-1, keepdims=True)
    e = jnp.exp(logits - m)
    denom = jnp.sum(e, axis=-1, keepdims=True)
    o_ref[...] = (e * pl.reciprocal(denom, approx=True)).astype(o_ref.dtype)


def _dd_kernel_single_k(x_ref, w_ref, b_ref, o_ref):
    # x_ref: (block_b, F), w_ref: (F, Lp), b_ref: (1, Lp), o_ref: (block_b, Lp)
    logits = jnp.dot(x_ref[...], w_ref[...], preferred_element_type=jnp.float32)
    logits = logits + b_ref[...].astype(jnp.float32)
    _softmax_store(logits, o_ref)


def _dd_kernel_tiled_resident(x_ref, w_ref, b_ref, o_ref, acc_ref, *, block_k):
    # Weight is fully resident in VMEM (grid-invariant); slice the K block out.
    k = pl.program_id(1)

    @pl.when(k == 0)
    def _():
        # fold the bias into the accumulator init (saves a finalize VPU pass)
        acc_ref[...] = jnp.broadcast_to(
            b_ref[...].astype(jnp.float32), acc_ref.shape
        )

    off = pl.multiple_of(k * block_k, block_k)
    acc_ref[...] += jnp.dot(
        x_ref[...], w_ref[pl.ds(off, block_k), :],
        preferred_element_type=jnp.float32,
    )

    @pl.when(k == pl.num_programs(1) - 1)
    def _():
        _softmax_store(acc_ref[...], o_ref)


def _dd_kernel_tiled_stream(x_ref, w_ref, b_ref, o_ref, acc_ref):
    # Fallback when the weight is too large to keep resident: stream per-K block.
    k = pl.program_id(1)

    @pl.when(k == 0)
    def _():
        acc_ref[...] = jnp.broadcast_to(
            b_ref[...].astype(jnp.float32), acc_ref.shape
        )

    acc_ref[...] += jnp.dot(
        x_ref[...], w_ref[...], preferred_element_type=jnp.float32
    )

    @pl.when(k == pl.num_programs(1) - 1)
    def _():
        _softmax_store(acc_ref[...], o_ref)


@functools.partial(jax.jit, static_argnames=("block_b", "block_k", "compute_dtype"))
def dd_forward(data, weight_t, bias, *, block_b=None, block_k=None,
               compute_dtype=None):
    """Forward pass of DD: softmax(data @ weight_t + bias, axis=1).

    data:     (B, in_features)
    weight_t: (in_features, labels)  (transpose of the PyTorch nn.Linear weight)
    bias:     (labels,) or (1, labels)
    compute_dtype: e.g. jnp.bfloat16 for a mem-bound fast path (f32 accumulate)
    returns:  (B, labels) probabilities in data.dtype
    """
    B, F = data.shape
    F2, L = weight_t.shape
    assert F == F2, "weight_t must be (in_features, labels)"
    bias = bias.reshape(1, L).astype(jnp.float32)

    out_dtype = data.dtype
    x = data if compute_dtype is None else data.astype(compute_dtype)
    w = weight_t if compute_dtype is None else weight_t.astype(compute_dtype)

    xisz = jnp.dtype(x.dtype).itemsize
    wisz = jnp.dtype(w.dtype).itemsize
    oisz = jnp.dtype(out_dtype).itemsize

    sub = {1: 32, 2: 16, 4: 8}.get(xisz, 8)   # sublane multiple per compute dtype
    Lp = max(128, _round_up(L, 128))          # lane-dense logits / output stores
    budget = _vmem_budget_bytes()

    # ---- batch tiling (no batch padding: Pallas masks the boundary block) ----
    if block_b is None:
        nb = max(1, _cdiv(B, 512))
        if B >= 256:
            nb = max(nb, 2)   # keep both v7x TensorCores fed; ~neutral on v5e/v6e
        block_b = min(_round_up(_cdiv(B, nb), sub), _round_up(B, sub))
    else:
        block_b = min(_round_up(block_b, sub), _round_up(B, sub))
    nb = _cdiv(B, block_b)

    # ---- K tiling: single-K whenever tiles fit the per-generation budget -----
    if block_k is None:
        single_k_bytes = (
            2 * block_b * F * xisz        # x, double-buffered
            + F * Lp * wisz               # weight, resident (single-buffered)
            + 2 * 8 * Lp * 4              # bias (sublane-padded)
            + 2 * block_b * Lp * oisz     # out, double-buffered
        )
        if single_k_bytes <= budget:
            block_k = F
        else:
            # prefer a lane-aligned block that divides F (no K pad / no x copy)
            for cand in (2048, 1024, 512, 384, 256, 128):
                if F % cand == 0:
                    block_k = cand
                    break
            else:
                block_k = 1024

    if block_k >= F:
        block_k, Fp, nk = F, F, 1
    else:
        block_k = _round_up(block_k, 128)
        if block_k >= F:
            block_k, Fp, nk = F, F, 1
        else:
            Fp = _round_up(F, block_k)
            nk = Fp // block_k

    # ---- padding: only the label dim (small), and x's K dim iff block_k ∤ F ---
    if nk > 1 and Fp != F:
        x = jnp.pad(x, ((0, 0), (0, Fp - F)))   # reduction pad must be zeros
    if Fp != F or Lp != L:
        w = jnp.pad(w, ((0, Fp - F), (0, Lp - L)))
    b = (jnp.pad(bias, ((0, 0), (0, Lp - L)), constant_values=_NEG_BIG)
         if Lp != L else bias)

    inv = _invariant_buffer_kwargs()
    acc_bytes = block_b * Lp * 4
    tiled_fixed = (2 * block_b * block_k * xisz + 2 * 8 * Lp * 4
                   + 2 * block_b * Lp * oisz + acc_bytes)

    if nk == 1:
        grid = (nb,)
        in_specs = [
            pl.BlockSpec((block_b, Fp), lambda i: (i, 0)),
            pl.BlockSpec((Fp, Lp), lambda i: (0, 0), **inv),   # grid-invariant
            pl.BlockSpec((1, Lp), lambda i: (0, 0), **inv),    # grid-invariant
        ]
        out_specs = pl.BlockSpec((block_b, Lp), lambda i: (i, 0))
        scratch_shapes = []
        kernel = _dd_kernel_single_k
        dim_sem = ("parallel",)
    elif Fp * Lp * wisz + tiled_fixed <= budget:
        # K-tiled, but the weight stays resident across the whole grid
        grid = (nb, nk)
        in_specs = [
            pl.BlockSpec((block_b, block_k), lambda i, k: (i, k)),
            pl.BlockSpec((Fp, Lp), lambda i, k: (0, 0), **inv),  # loaded once
            pl.BlockSpec((1, Lp), lambda i, k: (0, 0), **inv),
        ]
        out_specs = pl.BlockSpec((block_b, Lp), lambda i, k: (i, 0))
        scratch_shapes = [pltpu.VMEM((block_b, Lp), jnp.float32)]
        kernel = functools.partial(_dd_kernel_tiled_resident, block_k=block_k)
        dim_sem = ("parallel", "arbitrary")
    else:
        # K-tiled with the weight streamed per K block
        grid = (nb, nk)
        in_specs = [
            pl.BlockSpec((block_b, block_k), lambda i, k: (i, k)),
            pl.BlockSpec((block_k, Lp), lambda i, k: (k, 0)),
            pl.BlockSpec((1, Lp), lambda i, k: (0, 0), **inv),
        ]
        out_specs = pl.BlockSpec((block_b, Lp), lambda i, k: (i, 0))
        scratch_shapes = [pltpu.VMEM((block_b, Lp), jnp.float32)]
        kernel = _dd_kernel_tiled_stream
        dim_sem = ("parallel", "arbitrary")

    cost = pl.CostEstimate(
        flops=int(2 * B * Fp * Lp),
        transcendentals=int(B * Lp),
        bytes_accessed=int(B * Fp * xisz + Fp * Lp * wisz + B * Lp * oisz),
    )

    out = pl.pallas_call(
        kernel,
        out_shape=jax.ShapeDtypeStruct((B, Lp), out_dtype),
        grid_spec=pltpu.PrefetchScalarGridSpec(
            num_scalar_prefetch=0,
            grid=grid,
            in_specs=in_specs,
            out_specs=out_specs,
            scratch_shapes=scratch_shapes,
        ),
        compiler_params=pltpu.CompilerParams(
            dimension_semantics=dim_sem,
            vmem_limit_bytes=int(budget),
        ),
        cost_estimate=cost,
    )(x, w, b)

    return out if Lp == L else out[:, :L]


def init_dd_params(key, in_features, labels, dtype=jnp.float32):
    """Mimic PyTorch nn.Linear default init (uniform +/- 1/sqrt(fan_in))."""
    kw, kb = jax.random.split(key)
    bound = 1.0 / (in_features ** 0.5)
    weight_t = jax.random.uniform(
        kw, (in_features, labels), dtype=dtype, minval=-bound, maxval=bound
    )
    bias = jax.random.uniform(
        kb, (1, labels), dtype=dtype, minval=-bound, maxval=bound
    )
    return weight_t, bias


if __name__ == "__main__":
    key = jax.random.PRNGKey(0)

    # ---- case 1: small shapes matching DD(in_features=32, ..., labels=4) -----
    batch, in_features, labels = 8, 32, 4
    kx, kp, key = jax.random.split(key, 3)
    data = jax.random.normal(kx, (batch, in_features), dtype=jnp.float32)
    weight_t, bias = init_dd_params(kp, in_features, labels)

    out = jax.block_until_ready(dd_forward(data, weight_t, bias))
    ref = jax.nn.softmax(data @ weight_t + bias, axis=1)
    assert out.shape == (batch, labels)
    assert jnp.allclose(out, ref, atol=5e-3, rtol=5e-3)
    assert jnp.allclose(jnp.sum(out, axis=1), 1.0, atol=5e-3)

    # ---- case 2: ragged batch, default heuristics (single-K, nb>=2, no x pad)
    batch2, in_features2, labels2 = 300, 640, 10
    kx2, kp2, key = jax.random.split(key, 3)
    data2 = jax.random.normal(kx2, (batch2, in_features2), dtype=jnp.float32)
    weight_t2, bias2 = init_dd_params(kp2, in_features2, labels2)
    ref2 = jax.nn.softmax(data2 @ weight_t2 + bias2, axis=1)

    out2 = jax.block_until_ready(dd_forward(data2, weight_t2, bias2))
    assert out2.shape == (batch2, labels2)
    assert jnp.allclose(out2, ref2, atol=5e-3, rtol=5e-3)
    assert jnp.allclose(jnp.sum(out2, axis=1), 1.0, atol=5e-3)

    # ---- case 3: force the K-tiled accumulator path (resident W, block_k | F)
    out3 = jax.block_until_ready(
        dd_forward(data2, weight_t2, bias2, block_b=128, block_k=128)
    )
    assert out3.shape == (batch2, labels2)
    assert jnp.allclose(out3, ref2, atol=5e-3, rtol=5e-3)

    # ---- case 4: bf16 fast path (f32 accumulate + f32 softmax math) ----------
    out4 = jax.block_until_ready(
        dd_forward(data2, weight_t2, bias2, compute_dtype=jnp.bfloat16)
    )
    assert out4.shape == (batch2, labels2)
    assert jnp.allclose(out4, ref2, atol=3e-2, rtol=3e-2)
    assert jnp.allclose(jnp.sum(out4, axis=1), 1.0, atol=1e-2)

    print("KERNEL_OK")
</pallas_src>

<mosaic_0001>
module attributes {stable_mosaic.version = 11 : i64} {
  func.func @_dd_kernel_single_k(%arg0: i32, %arg1: memref<8x32xf32, #tpu.memory_space<vmem>>, %arg2: memref<32x128xf32, #tpu.memory_space<vmem>>, %arg3: memref<1x128xf32, #tpu.memory_space<vmem>>, %arg4: memref<8x128xf32, #tpu.memory_space<vmem>>) attributes {dimension_semantics = [#tpu.dimension_semantics<parallel>], iteration_bounds = array<i64: 1>, scalar_prefetch = 0 : i64, scratch_operands = 0 : i64, tpu.core_type = #tpu.core_type<tc>, window_params = [{transform_indices = @transform_0, window_bounds = array<i64: 8, 32>}, {pipeline_mode = #tpu.pipeline_mode<synchronous>, transform_indices = @transform_1, window_bounds = array<i64: 32, 128>}, {pipeline_mode = #tpu.pipeline_mode<synchronous>, transform_indices = @transform_2, window_bounds = array<i64: 1, 128>}, {transform_indices = @transform_3, window_bounds = array<i64: 8, 128>}]} {
    %c0 = arith.constant 0 : index
    %c0_0 = arith.constant 0 : index
    %0 = vector.load %arg1[%c0, %c0_0] : memref<8x32xf32, #tpu.memory_space<vmem>>, vector<8x32xf32>
    %c0_1 = arith.constant 0 : index
    %c0_2 = arith.constant 0 : index
    %1 = vector.load %arg2[%c0_1, %c0_2] : memref<32x128xf32, #tpu.memory_space<vmem>>, vector<32x128xf32>
    %cst = arith.constant dense<0.000000e+00> : vector<8x128xf32>
    %2 = tpu.matmul %0, %1, %cst {dimension_numbers = #tpu.dot_dimension_numbers<[1], [0], [0], [1], [0, 0, 1, 1], [], []>} : vector<8x32xf32>, vector<32x128xf32>, vector<8x128xf32> -> vector<8x128xf32>
    %c0_3 = arith.constant 0 : index
    %c0_4 = arith.constant 0 : index
    %3 = vector.load %arg3[%c0_3, %c0_4] : memref<1x128xf32, #tpu.memory_space<vmem>>, vector<1x128xf32>
    %4 = vector.broadcast %3 : vector<1x128xf32> to vector<8x128xf32>
    %5 = arith.addf %2, %4 : vector<8x128xf32>
    %cst_5 = arith.constant dense<0xFF800000> : vector<8xf32>
    %6 = vector.multi_reduction <maximumf>, %5, %cst_5 [1] : vector<8x128xf32> to vector<8xf32>
    %7 = vector.shape_cast %6 : vector<8xf32> to vector<8x1xf32>
    %8 = vector.broadcast %7 : vector<8x1xf32> to vector<8x128xf32>
    %9 = arith.subf %5, %8 : vector<8x128xf32>
    %10 = math.exp %9 : vector<8x128xf32>
    %cst_6 = arith.constant dense<0.000000e+00> : vector<8xf32>
    %11 = vector.multi_reduction <add>, %10, %cst_6 [1] : vector<8x128xf32> to vector<8xf32>
    %12 = vector.shape_cast %11 : vector<8xf32> to vector<8x1xf32>
    %13 = tpu.reciprocal %12 {approx = true} : vector<8x1xf32> -> vector<8x1xf32>
    %14 = vector.broadcast %13 : vector<8x1xf32> to vector<8x128xf32>
    %15 = arith.mulf %10, %14 : vector<8x128xf32>
    %c0_7 = arith.constant 0 : index
    %c0_8 = arith.constant 0 : index
    %16 = vector.load %arg4[%c0_7, %c0_8] : memref<8x128xf32, #tpu.memory_space<vmem>>, vector<8x128xf32>
    tpu.vector_store %arg4[%c0_7, %c0_8], %15 {strides = array<i32>} : memref<8x128xf32, #tpu.memory_space<vmem>>, vector<8x128xf32>,
    return
  }
  func.func @transform_0(%arg0: i32) -> (i32, i32) {
    %c0_i32 = arith.constant 0 : i32
    %c0_i32_0 = arith.constant 0 : i32
    return %arg0, %c0_i32 : i32, i32
  }
  func.func @transform_1(%arg0: i32) -> (i32, i32) {
    %c0_i32 = arith.constant 0 : i32
    %c0_i32_0 = arith.constant 0 : i32
    %c0_i32_1 = arith.constant 0 : i32
    return %c0_i32, %c0_i32_0 : i32, i32
  }
  func.func @transform_2(%arg0: i32) -> (i32, i32) {
    %c0_i32 = arith.constant 0 : i32
    %c0_i32_0 = arith.constant 0 : i32
    %c0_i32_1 = arith.constant 0 : i32
    return %c0_i32, %c0_i32_0 : i32, i32
  }
  func.func @transform_3(%arg0: i32) -> (i32, i32) {
    %c0_i32 = arith.constant 0 : i32
    %c0_i32_0 = arith.constant 0 : i32
    return %arg0, %c0_i32 : i32, i32
  }
}

</mosaic_0001>

<bundles_post_ra>
// kernel: dd_forward.1
= control target key start
LH: loop header
LB: loop body
LE: loop exit
PB: predicated region body
PF: predicated region fallthrough
CT: control target
= control target key end

     0   :  { %v145_v0 = vmov 0.0|0.0   ;;  %vm146_vm0 = vmmov 0   ;;  %v147_v4 = vmov 0.0   ;;  %vm26_vm1 = vcmask 261120   ;;  %s189_s1 = inlined_call_operand.vmem [shape: f32[32,128], index: 1, kind: input, shape index: {}]   ;;  %s190_s0 = inlined_call_operand.vmem [shape: f32[8,32], index: 0, kind: input, shape index: {}]   ;;  %s191_s2 = inlined_call_operand.vmem [shape: f32[1,128], index: 2, kind: input, shape index: {}]   ;;  %s192_s3 = inlined_call_operand.vmem [shape: f32[8,128], index: 3, kind: output, shape index: {}]  }
   0x1   :  { %132 = vmatprep.subr.bf16.mxu0 %v145_v0  ;;  %v15_v1 = vld [vmem:[%s189_s1] sm:$0xff]  ;;  %v16_v2 = vld [vmem:[%s189_s1 + $0x8] sm:$0xff]  ;;  %v17_v3 = vld [vmem:[%s189_s1 + $0x10] sm:$0xff]  ;;  %129 = vmatprep.mubr.msk.f32.mxu0 %vm146_vm0, %v147_v4 }
   0x2   :  { %v133_v5 = vpack.c.bf16 %v16_v2, %v15_v1  ;;  %v18_v6 = vld [vmem:[%s189_s1 + $0x18] sm:$0xff]  ;;  %v14_v8 = vld [vmem:[%s190_s0] sm:$0xff] }
   0x3   :  { %v136_v7 = vpack.c.bf16 %v18_v6, %v17_v3  ;;  %v114_v9 = vld [vmem:[%s191_s2] ss:$0 sm:$0xff] }
   0x4   :  { %134 = vmatpush3.bf16.msra.mxu0 %v133_v5 }
   0x5   :  { %135 = vmatprep.subr.bf16.mxu0 %v145_v0 }
   0x8   :  { %137 = vmatpush3.bf16.msra.mxu0 %v136_v7 }
   0xb   :  { %130 = vmatmul.mubr.msk.f32.vlgmr.msra.gmra.mrb[0].mxu0 %vm26_vm1, %v14_v8 }
  0xde   :  { %v96_v10 = vpop.f32.mrb[0].mxu0 }
  0xdf   :  { %v97_v11 = vadd.f32 %v114_v9, %v96_v10  ;;  %v131_v12 = vpop.f32.mrb[1].mxu0 }
  0xe1   :  { %100 = vmax.xlane.f32.xlu0 %v97_v11 }
 0x16e   :  { %v101_v13 = vpop.xlane.xlu0 %100 }
 0x16f   :  { %v102_v14 = vsub.f32 %v97_v11, %v101_v13 }
 0x171   :  { %v103_v15 = vmul.f32 1.442695, %v102_v14 }
 0x173   :  { %141 = vpow2.f32 %v103_v15 }
 0x17d   :  { %v142_v16 = vpop.eup %141 }
 0x17e   :  { %105 = vadd.xlane.f32.xlu0 %v142_v16 }
 0x20b   :  { %v106_v17 = vpop.xlane.xlu0 %105 }
 0x20c   :  { %143 = vrcp.f32 %v106_v17 }
 0x216   :  { %v144_v18 = vpop.eup %143 }
 0x217   :  { %v108_v19 = vmul.f32 %v144_v18, %v142_v16 }
 0x219   :  { %109 = vst [vmem:[%s192_s3] sm:$0xff] %v108_v19 }

</bundles_post_ra>
